<compile_context>
chip_gen: v7x
topology: tpu7x:2x2x1
jax: 0.10.0
libtpu: 0.0.40
codegen_flags: <defaults>
</compile_context>

<pallas_src>
import functools

import numpy as np
import jax
import jax.numpy as jnp
from jax.experimental import pallas as pl
from jax.experimental.pallas import tpu as pltpu


_LANE_TILE = 128   # lane-dense tile width
_SUBLANE = 8       # minimum sublane extent


# ----------------------------------------------------------------------------
# In-kernel helper: bit masks and roll-based pair exchange (cached per call)
# ----------------------------------------------------------------------------

class _GateCtx:
    """Per-kernel-invocation helpers for the (rows, lanes) state layout.

    Row index encodes qubits [0, n-k) (qubit 0 = MSB); lane index encodes the
    last k qubits (as the high bits) and the padded batch (low bits).
    """

    def __init__(self, n_qubits, n_lane_qubits, lane_batch, rows, lanes):
        self.n = n_qubits
        self.k = n_lane_qubits
        self.lane_batch = lane_batch          # power of two
        self._size = (rows, lanes)
        self._idx = (jax.lax.broadcasted_iota(jnp.int32, (rows, lanes), 0),
                     jax.lax.broadcasted_iota(jnp.int32, (rows, lanes), 1))
        self._bit0 = {}
        self._use_a = {}

    def _axis_stride(self, qubit):
        if qubit >= self.n - self.k:          # lane-axis qubit
            return 1, (1 << (self.n - 1 - qubit)) * self.lane_batch
        return 0, 1 << (self.n - self.k - 1 - qubit)

    def bit_is_zero(self, qubit):
        """(rows, lanes) bool mask: True where `qubit` is |0> at that index."""
        if qubit not in self._bit0:
            axis, d = self._axis_stride(qubit)
            self._bit0[qubit] = (self._idx[axis] & d) == 0
        return self._bit0[qubit]

    def partner(self, x, qubit):
        """x at the index with `qubit`'s bit flipped (pair exchange).

        Two static pltpu.rolls (XLU) + a select.  The select mask is derived
        by rolling the index iota with the *same* roll call and comparing to
        the wanted partner index, so correctness does not depend on the roll
        direction convention.  Padded rows/lanes may contain junk but are
        never read by real positions (partners of real indices are real).
        """
        axis, d = self._axis_stride(qubit)
        size = self._size[axis]
        key = (axis, d)
        if key not in self._use_a:
            idx = self._idx[axis]
            want = jnp.where(self.bit_is_zero(qubit), idx + d, idx - d)
            self._use_a[key] = pltpu.roll(idx, d, axis) == want
        use_a = self._use_a[key]
        return jnp.where(use_a,
                         pltpu.roll(x, d, axis),
                         pltpu.roll(x, size - d, axis))


# ----------------------------------------------------------------------------
# Operation descriptors (their math is emitted inside the fused kernel)
# ----------------------------------------------------------------------------

class RotationGate:
    """RX / RY / RZ on one qubit; angle = thetas[theta_index] (broadcast)."""

    def __init__(self, axis, qubit, theta_index):
        assert axis in ("X", "Y", "Z")
        self.axis = axis
        self.qubit = qubit
        self.theta_index = theta_index

    def emit(self, s_re, s_im, ctx, cos_ref, sin_ref, coef_ref):
        c = cos_ref[self.theta_index]          # cos(theta/2) scalar from SMEM
        s = sin_ref[self.theta_index]          # sin(theta/2)
        q = self.qubit
        if self.axis == "Z":
            # diag(c - i s, c + i s): diagonal -> no pair exchange needed
            a_im = jnp.where(ctx.bit_is_zero(q), -s, s)
            return c * s_re - a_im * s_im, c * s_im + a_im * s_re
        p_re = ctx.partner(s_re, q)
        p_im = ctx.partner(s_im, q)
        if self.axis == "X":
            # [[c, -i s], [-i s, c]]
            return c * s_re + s * p_im, c * s_im - s * p_re
        # Y: [[c, -s], [s, c]] (real)
        b = jnp.where(ctx.bit_is_zero(q), -s, s)
        return c * s_re + b * p_re, c * s_im + b * p_im


class CNOT:
    """Controlled-NOT: pure index remap (rolls + select), no FLOPs."""

    def __init__(self, control, target):
        assert control != target
        self.control = control
        self.target = target

    def emit(self, s_re, s_im, ctx, cos_ref, sin_ref, coef_ref):
        ctrl_one = jnp.logical_not(ctx.bit_is_zero(self.control))
        p_re = ctx.partner(s_re, self.target)
        p_im = ctx.partner(s_im, self.target)
        return (jnp.where(ctrl_one, p_re, s_re),
                jnp.where(ctrl_one, p_im, s_im))


class _FusedSingleQubitGate:
    """General 2x2 unitary [[a, b], [c, d]]; coefficients in coef[8*slot:+8]."""

    def __init__(self, qubit, slot):
        self.qubit = qubit
        self.slot = slot

    def emit(self, s_re, s_im, ctx, cos_ref, sin_ref, coef_ref):
        o = 8 * self.slot
        a_re, a_im = coef_ref[o + 0], coef_ref[o + 1]
        b_re, b_im = coef_ref[o + 2], coef_ref[o + 3]
        c_re, c_im = coef_ref[o + 4], coef_ref[o + 5]
        d_re, d_im = coef_ref[o + 6], coef_ref[o + 7]
        bit0 = ctx.bit_is_zero(self.qubit)
        p_re = ctx.partner(s_re, self.qubit)
        p_im = ctx.partner(s_im, self.qubit)
        u_re = jnp.where(bit0, a_re, d_re)
        u_im = jnp.where(bit0, a_im, d_im)
        v_re = jnp.where(bit0, b_re, c_re)
        v_im = jnp.where(bit0, b_im, c_im)
        new_re = u_re * s_re - u_im * s_im + v_re * p_re - v_im * p_im
        new_im = u_re * s_im + u_im * s_re + v_re * p_im + v_im * p_re
        return new_re, new_im


# ----------------------------------------------------------------------------
# Host-side planning: commutation-aware fusion of same-qubit rotation runs
# ----------------------------------------------------------------------------

def _plan_circuit(operations):
    plan = []
    fused_groups = []
    pending = {}

    def flush(q):
        group = pending.pop(q, None)
        if not group:
            return
        if len(group) == 1:
            plan.append(group[0])
        else:
            plan.append(_FusedSingleQubitGate(q, len(fused_groups)))
            fused_groups.append(tuple(group))

    n_theta = 0
    for op in operations:
        if isinstance(op, RotationGate):
            n_theta = max(n_theta, op.theta_index + 1)
            pending.setdefault(op.qubit, []).append(op)
        elif isinstance(op, CNOT):
            flush(op.control)
            flush(op.target)
            plan.append(op)
        else:
            raise TypeError(f"unsupported operation: {op!r}")
    for q in sorted(pending):
        flush(q)
    return tuple(plan), tuple(fused_groups), n_theta


def _fused_coefficients(fused_groups, cos_h, sin_h):
    """2x2 unitary per fused group, flattened to a (8 * n_groups,) f32 table."""
    if not fused_groups:
        return jnp.zeros((8,), jnp.float32)
    rows = []
    for group in fused_groups:
        m = jnp.eye(2, dtype=jnp.complex64)
        for g in group:                       # gates apply left-to-right
            c = cos_h[g.theta_index]
            s = sin_h[g.theta_index]
            if g.axis == "X":
                gm = jnp.stack([jnp.stack([c + 0j, -1j * s]),
                                jnp.stack([-1j * s, c + 0j])])
            elif g.axis == "Y":
                gm = jnp.stack([jnp.stack([c + 0j, -s + 0j]),
                                jnp.stack([s + 0j, c + 0j])])
            else:  # Z
                zero = jnp.zeros((), jnp.complex64)
                gm = jnp.stack([jnp.stack([c - 1j * s, zero]),
                                jnp.stack([zero, c + 1j * s])])
            m = gm @ m
        rows.append(jnp.stack([
            jnp.real(m[0, 0]), jnp.imag(m[0, 0]),
            jnp.real(m[0, 1]), jnp.imag(m[0, 1]),
            jnp.real(m[1, 0]), jnp.imag(m[1, 0]),
            jnp.real(m[1, 1]), jnp.imag(m[1, 1])]))
    return jnp.concatenate(rows).astype(jnp.float32)


# ----------------------------------------------------------------------------
# The fused Pallas kernel: whole circuit, state resident on-chip
# ----------------------------------------------------------------------------

def _circuit_kernel(plan, n_qubits, n_lane_qubits, lane_batch,
                    cos_ref, sin_ref, coef_ref, st_ref, out_ref):
    _, rows, lanes = st_ref.shape
    ctx = _GateCtx(n_qubits, n_lane_qubits, lane_batch, rows, lanes)
    s_re = st_ref[0, :, :]                    # one HBM->VMEM load of the tile
    s_im = st_ref[1, :, :]
    for op in plan:                           # static unroll at trace time
        s_re, s_im = op.emit(s_re, s_im, ctx, cos_ref, sin_ref, coef_ref)
    out_ref[0, :, :] = s_re                   # one lane-dense store at the end
    out_ref[1, :, :] = s_im


def _run_fused_circuit(plan, n_qubits, n_lane_qubits, lane_batch,
                       cos_h, sin_h, coef, packed):
    _, rows, total_lanes = packed.shape
    grid = (total_lanes // _LANE_TILE,)
    state_spec = pl.BlockSpec((2, rows, _LANE_TILE), lambda i: (0, 0, i))
    smem_spec = pl.BlockSpec(memory_space=pltpu.MemorySpace.SMEM)
    kernel = functools.partial(_circuit_kernel, plan, n_qubits,
                               n_lane_qubits, lane_batch)

    params = {"dimension_semantics": ("parallel",)}   # batch tiles -> both TCs
    block_bytes = 2 * rows * _LANE_TILE * 4
    needed = 8 * block_bytes + (4 << 20)      # in+out double-buffered + temps
    if needed > (32 << 20):
        params["vmem_limit_bytes"] = int(min(needed, 120 << 20))

    return pl.pallas_call(
        kernel,
        grid=grid,
        in_specs=[smem_spec, smem_spec, smem_spec, state_spec],
        out_specs=state_spec,
        out_shape=jax.ShapeDtypeStruct(packed.shape, jnp.float32),
        input_output_aliases={3: 0},          # reuse padded state buffer
        compiler_params=pltpu.CompilerParams(**params),
    )(cos_h, sin_h, coef, packed)


# ----------------------------------------------------------------------------
# QuantumCircuit equivalent
# ----------------------------------------------------------------------------

def zero_state(n_qubits, batch_size=1, dtype=jnp.complex64):
    state = jnp.zeros((2 ** n_qubits, batch_size), dtype=dtype)
    state = state.at[0].set(1)
    return state.reshape([2] * n_qubits + [batch_size])


class QuantumCircuit:
    def __init__(self, n_qubits, operations):
        self.n_qubits = n_qubits
        self.operations = list(operations)
        self._plan, self._fused_groups, self._n_theta = _plan_circuit(
            self.operations)

    def init_state(self, batch_size):
        return zero_state(self.n_qubits, batch_size)

    def __call__(self, state, thetas=None):
        n = self.n_qubits
        dim = 2 ** n
        batch = state.shape[-1]
        psi = state.reshape(dim, batch)
        s_re = jnp.real(psi).astype(jnp.float32)
        s_im = jnp.imag(psi).astype(jnp.float32)

        # ---- angles / fused-unitary coefficients (SMEM inputs) ------------
        if self._n_theta > 0:
            if thetas is None:
                raise ValueError("circuit has parametric gates; thetas "
                                 "must be provided")
            th = jnp.atleast_1d(thetas).astype(jnp.float32)
            if th.shape[0] < self._n_theta:
                raise ValueError(f"need at least {self._n_theta} thetas, got "
                                 f"{th.shape[0]}")
        else:
            th = jnp.zeros((1,), jnp.float32)
        cos_h = jnp.cos(0.5 * th)
        sin_h = jnp.sin(0.5 * th)
        coef = _fused_coefficients(self._fused_groups, cos_h, sin_h)

        # ---- lane-dense layout: fold low-order qubits into the lane axis --
        b2 = 1
        while b2 < batch:
            b2 <<= 1
        k = 0
        if b2 < _LANE_TILE:
            while k < n and (b2 << (k + 1)) <= _LANE_TILE:
                k += 1
        if k > 0:
            if b2 != batch:
                s_re = jnp.pad(s_re, ((0, 0), (0, b2 - batch)))
                s_im = jnp.pad(s_im, ((0, 0), (0, b2 - batch)))
            lane_batch = b2
            rows_real = dim >> k
            lane_real = b2 << k
            s_re = s_re.reshape(rows_real, lane_real)
            s_im = s_im.reshape(rows_real, lane_real)
        else:
            lane_batch = 1                    # unused (no lane qubits)
            rows_real = dim
            lane_real = batch

        rows_pad = max(_SUBLANE, rows_real)
        lanes_pad = ((lane_real + _LANE_TILE - 1) // _LANE_TILE) * _LANE_TILE
        pad = ((0, rows_pad - rows_real), (0, lanes_pad - lane_real))
        if pad != ((0, 0), (0, 0)):
            s_re = jnp.pad(s_re, pad)
            s_im = jnp.pad(s_im, pad)
        packed = jnp.stack([s_re, s_im])      # (2, rows_pad, lanes_pad)

        out = _run_fused_circuit(self._plan, n, k, lane_batch,
                                 cos_h, sin_h, coef, packed)

        o_re = out[0, :rows_real, :lane_real]
        o_im = out[1, :rows_real, :lane_real]
        if k > 0:
            o_re = o_re.reshape(dim, b2)[:, :batch]
            o_im = o_im.reshape(dim, b2)[:, :batch]
        psi_out = (o_re + 1j * o_im).astype(jnp.complex64)
        return psi_out.reshape([2] * n + [batch])


# ----------------------------------------------------------------------------
# Pure-numpy reference (full 2^n x 2^n unitaries) for correctness checking
# ----------------------------------------------------------------------------

def reference_circuit(state_np, thetas_np, ops, n_qubits):
    dim = 2 ** n_qubits
    batch = state_np.shape[-1]
    psi = state_np.reshape(dim, batch).astype(np.complex128)
    for op in ops:
        if isinstance(op, RotationGate):
            t = float(thetas_np[op.theta_index])
            c, s = np.cos(t / 2), np.sin(t / 2)
            if op.axis == "X":
                g = np.array([[c, -1j * s], [-1j * s, c]])
            elif op.axis == "Y":
                g = np.array([[c, -s], [s, c]])
            else:
                g = np.array([[c - 1j * s, 0], [0, c + 1j * s]])
            U = np.kron(np.kron(np.eye(2 ** op.qubit), g),
                        np.eye(2 ** (n_qubits - 1 - op.qubit)))
        else:  # CNOT
            U = np.zeros((dim, dim), dtype=np.complex128)
            for i in range(dim):
                if (i >> (n_qubits - 1 - op.control)) & 1:
                    j = i ^ (1 << (n_qubits - 1 - op.target))
                else:
                    j = i
                U[j, i] = 1.0
        psi = U @ psi
    return psi.reshape([2] * n_qubits + [batch])


# ----------------------------------------------------------------------------
# Main
# ----------------------------------------------------------------------------

if __name__ == "__main__":
    n_qubits = 5
    batch = 8

    key = jax.random.PRNGKey(0)
    k_theta, k_re, k_im = jax.random.split(key, 3)

    thetas = jax.random.uniform(k_theta, (2 * n_qubits,), jnp.float32,
                                0.0, 2.0 * np.pi)

    operations = (
        [RotationGate("X", q, q) for q in range(n_qubits)]
        + [RotationGate("Y", q, n_qubits + q) for q in range(n_qubits)]
        + [CNOT(q, q + 1) for q in range(n_qubits - 1)]
    )
    circuit = QuantumCircuit(n_qubits, operations)

    # Deterministic random input state (normalised per batch column).
    re = jax.random.normal(k_re, (2 ** n_qubits, batch), jnp.float32)
    im = jax.random.normal(k_im, (2 ** n_qubits, batch), jnp.float32)
    psi = re + 1j * im
    psi = psi / jnp.linalg.norm(psi, axis=0, keepdims=True)
    state = psi.astype(jnp.complex64).reshape([2] * n_qubits + [batch])

    fwd = jax.jit(lambda st, th: circuit(st, th))
    out = jax.block_until_ready(fwd(state, thetas))

    ref = reference_circuit(np.asarray(state), np.asarray(thetas),
                            operations, n_qubits)
    np.testing.assert_allclose(np.asarray(out), ref, atol=1e-4, rtol=1e-4)

    # sanity: unitarity preserves norms
    norms = np.linalg.norm(np.asarray(out).reshape(2 ** n_qubits, batch),
                           axis=0)
    np.testing.assert_allclose(norms, np.ones(batch), atol=1e-4)

    print("KERNEL_OK")
</pallas_src>

<mosaic_0001>
module attributes {stable_mosaic.version = 11 : i64} {
  func.func @_circuit_kernel(%arg0: i32, %arg1: memref<10xf32, #tpu.memory_space<smem>>, %arg2: memref<10xf32, #tpu.memory_space<smem>>, %arg3: memref<40xf32, #tpu.memory_space<smem>>, %arg4: memref<2x8x128xf32, #tpu.memory_space<vmem>>, %arg5: memref<2x8x128xf32, #tpu.memory_space<vmem>>) attributes {dimension_semantics = [#tpu.dimension_semantics<parallel>], iteration_bounds = array<i64: 1>, scalar_prefetch = 0 : i64, scratch_operands = 0 : i64, tpu.core_type = #tpu.core_type<tc>, window_params = [{transform_indices = @transform_0, window_bounds = array<i64: 10>}, {transform_indices = @transform_1, window_bounds = array<i64: 10>}, {transform_indices = @transform_2, window_bounds = array<i64: 40>}, {transform_indices = @transform_3, window_bounds = array<i64: 2, 8, 128>}, {transform_indices = @transform_4, window_bounds = array<i64: 2, 8, 128>}]} {
    %0 = tpu.iota {dimensions = array<i32: 0>} : vector<8x128xi32>
    %1 = tpu.iota {dimensions = array<i32: 1>} : vector<8x128xi32>
    %c0 = arith.constant 0 : index
    %c0_0 = arith.constant 0 : index
    %c0_1 = arith.constant 0 : index
    %2 = vector.load %arg4[%c0, %c0_0, %c0_1] : memref<2x8x128xf32, #tpu.memory_space<vmem>>, vector<1x8x128xf32>
    %3 = vector.shape_cast %2 : vector<1x8x128xf32> to vector<8x128xf32>
    %c1 = arith.constant 1 : index
    %c0_2 = arith.constant 0 : index
    %c0_3 = arith.constant 0 : index
    %4 = vector.load %arg4[%c1, %c0_2, %c0_3] : memref<2x8x128xf32, #tpu.memory_space<vmem>>, vector<1x8x128xf32>
    %5 = vector.shape_cast %4 : vector<1x8x128xf32> to vector<8x128xf32>
    %c0_4 = arith.constant 0 : index
    %6 = memref.load %arg3[%c0_4] : memref<40xf32, #tpu.memory_space<smem>>
    %c1_5 = arith.constant 1 : index
    %7 = memref.load %arg3[%c1_5] : memref<40xf32, #tpu.memory_space<smem>>
    %c2 = arith.constant 2 : index
    %8 = memref.load %arg3[%c2] : memref<40xf32, #tpu.memory_space<smem>>
    %c3 = arith.constant 3 : index
    %9 = memref.load %arg3[%c3] : memref<40xf32, #tpu.memory_space<smem>>
    %c4 = arith.constant 4 : index
    %10 = memref.load %arg3[%c4] : memref<40xf32, #tpu.memory_space<smem>>
    %c5 = arith.constant 5 : index
    %11 = memref.load %arg3[%c5] : memref<40xf32, #tpu.memory_space<smem>>
    %c6 = arith.constant 6 : index
    %12 = memref.load %arg3[%c6] : memref<40xf32, #tpu.memory_space<smem>>
    %c7 = arith.constant 7 : index
    %13 = memref.load %arg3[%c7] : memref<40xf32, #tpu.memory_space<smem>>
    %c1_i32 = arith.constant 1 : i32
    %14 = vector.broadcast %c1_i32 : i32 to vector<8x128xi32>
    %15 = arith.andi %0, %14 : vector<8x128xi32>
    %c0_i32 = arith.constant 0 : i32
    %16 = vector.broadcast %c0_i32 : i32 to vector<8x128xi32>
    %17 = arith.cmpi eq, %15, %16 : vector<8x128xi32>
    %c1_i32_6 = arith.constant 1 : i32
    %18 = vector.broadcast %c1_i32_6 : i32 to vector<8x128xi32>
    %19 = arith.addi %0, %18 : vector<8x128xi32>
    %c1_i32_7 = arith.constant 1 : i32
    %20 = vector.broadcast %c1_i32_7 : i32 to vector<8x128xi32>
    %21 = arith.subi %0, %20 : vector<8x128xi32>
    %22 = arith.select %17, %19, %21 : vector<8x128xi1>, vector<8x128xi32>
    %c1_i32_8 = arith.constant 1 : i32
    %23 = tpu.dynamic_rotate %0 by %c1_i32_8 dim 0 : vector<8x128xi32>, i32 -> vector<8x128xi32>
    %24 = arith.cmpi eq, %23, %22 : vector<8x128xi32>
    %c1_i32_9 = arith.constant 1 : i32
    %25 = tpu.dynamic_rotate %3 by %c1_i32_9 dim 0 : vector<8x128xf32>, i32 -> vector<8x128xf32>
    %c7_i32 = arith.constant 7 : i32
    %26 = tpu.dynamic_rotate %3 by %c7_i32 dim 0 : vector<8x128xf32>, i32 -> vector<8x128xf32>
    %27 = arith.select %24, %25, %26 : vector<8x128xi1>, vector<8x128xf32>
    %c1_i32_10 = arith.constant 1 : i32
    %28 = tpu.dynamic_rotate %5 by %c1_i32_10 dim 0 : vector<8x128xf32>, i32 -> vector<8x128xf32>
    %c7_i32_11 = arith.constant 7 : i32
    %29 = tpu.dynamic_rotate %5 by %c7_i32_11 dim 0 : vector<8x128xf32>, i32 -> vector<8x128xf32>
    %30 = arith.select %24, %28, %29 : vector<8x128xi1>, vector<8x128xf32>
    %31 = vector.broadcast %6 : f32 to vector<8x128xf32>
    %32 = vector.broadcast %12 : f32 to vector<8x128xf32>
    %33 = arith.select %17, %31, %32 : vector<8x128xi1>, vector<8x128xf32>
    %34 = vector.broadcast %7 : f32 to vector<8x128xf32>
    %35 = vector.broadcast %13 : f32 to vector<8x128xf32>
    %36 = arith.select %17, %34, %35 : vector<8x128xi1>, vector<8x128xf32>
    %37 = vector.broadcast %8 : f32 to vector<8x128xf32>
    %38 = vector.broadcast %10 : f32 to vector<8x128xf32>
    %39 = arith.select %17, %37, %38 : vector<8x128xi1>, vector<8x128xf32>
    %40 = vector.broadcast %9 : f32 to vector<8x128xf32>
    %41 = vector.broadcast %11 : f32 to vector<8x128xf32>
    %42 = arith.select %17, %40, %41 : vector<8x128xi1>, vector<8x128xf32>
    %43 = arith.mulf %33, %3 : vector<8x128xf32>
    %44 = arith.mulf %36, %5 : vector<8x128xf32>
    %45 = arith.subf %43, %44 : vector<8x128xf32>
    %46 = arith.mulf %39, %27 : vector<8x128xf32>
    %47 = arith.addf %45, %46 : vector<8x128xf32>
    %48 = arith.mulf %42, %30 : vector<8x128xf32>
    %49 = arith.subf %47, %48 : vector<8x128xf32>
    %50 = arith.mulf %33, %5 : vector<8x128xf32>
    %51 = arith.mulf %36, %3 : vector<8x128xf32>
    %52 = arith.addf %50, %51 : vector<8x128xf32>
    %53 = arith.mulf %39, %30 : vector<8x128xf32>
    %54 = arith.addf %52, %53 : vector<8x128xf32>
    %55 = arith.mulf %42, %27 : vector<8x128xf32>
    %56 = arith.addf %54, %55 : vector<8x128xf32>
    %c8 = arith.constant 8 : index
    %57 = memref.load %arg3[%c8] : memref<40xf32, #tpu.memory_space<smem>>
    %c9 = arith.constant 9 : index
    %58 = memref.load %arg3[%c9] : memref<40xf32, #tpu.memory_space<smem>>
    %c10 = arith.constant 10 : index
    %59 = memref.load %arg3[%c10] : memref<40xf32, #tpu.memory_space<smem>>
    %c11 = arith.constant 11 : index
    %60 = memref.load %arg3[%c11] : memref<40xf32, #tpu.memory_space<smem>>
    %c12 = arith.constant 12 : index
    %61 = memref.load %arg3[%c12] : memref<40xf32, #tpu.memory_space<smem>>
    %c13 = arith.constant 13 : index
    %62 = memref.load %arg3[%c13] : memref<40xf32, #tpu.memory_space<smem>>
    %c14 = arith.constant 14 : index
    %63 = memref.load %arg3[%c14] : memref<40xf32, #tpu.memory_space<smem>>
    %c15 = arith.constant 15 : index
    %64 = memref.load %arg3[%c15] : memref<40xf32, #tpu.memory_space<smem>>
    %c64_i32 = arith.constant 64 : i32
    %65 = vector.broadcast %c64_i32 : i32 to vector<8x128xi32>
    %66 = arith.andi %1, %65 : vector<8x128xi32>
    %c0_i32_12 = arith.constant 0 : i32
    %67 = vector.broadcast %c0_i32_12 : i32 to vector<8x128xi32>
    %68 = arith.cmpi eq, %66, %67 : vector<8x128xi32>
    %c64_i32_13 = arith.constant 64 : i32
    %69 = vector.broadcast %c64_i32_13 : i32 to vector<8x128xi32>
    %70 = arith.addi %1, %69 : vector<8x128xi32>
    %c64_i32_14 = arith.constant 64 : i32
    %71 = vector.broadcast %c64_i32_14 : i32 to vector<8x128xi32>
    %72 = arith.subi %1, %71 : vector<8x128xi32>
    %73 = arith.select %68, %70, %72 : vector<8x128xi1>, vector<8x128xi32>
    %c64_i32_15 = arith.constant 64 : i32
    %74 = tpu.dynamic_rotate %1 by %c64_i32_15 dim 1 : vector<8x128xi32>, i32 -> vector<8x128xi32>
    %75 = arith.cmpi eq, %74, %73 : vector<8x128xi32>
    %c64_i32_16 = arith.constant 64 : i32
    %76 = tpu.dynamic_rotate %49 by %c64_i32_16 dim 1 : vector<8x128xf32>, i32 -> vector<8x128xf32>
    %c64_i32_17 = arith.constant 64 : i32
    %77 = tpu.dynamic_rotate %49 by %c64_i32_17 dim 1 : vector<8x128xf32>, i32 -> vector<8x128xf32>
    %78 = arith.select %75, %76, %77 : vector<8x128xi1>, vector<8x128xf32>
    %c64_i32_18 = arith.constant 64 : i32
    %79 = tpu.dynamic_rotate %56 by %c64_i32_18 dim 1 : vector<8x128xf32>, i32 -> vector<8x128xf32>
    %c64_i32_19 = arith.constant 64 : i32
    %80 = tpu.dynamic_rotate %56 by %c64_i32_19 dim 1 : vector<8x128xf32>, i32 -> vector<8x128xf32>
    %81 = arith.select %75, %79, %80 : vector<8x128xi1>, vector<8x128xf32>
    %82 = vector.broadcast %57 : f32 to vector<8x128xf32>
    %83 = vector.broadcast %63 : f32 to vector<8x128xf32>
    %84 = arith.select %68, %82, %83 : vector<8x128xi1>, vector<8x128xf32>
    %85 = vector.broadcast %58 : f32 to vector<8x128xf32>
    %86 = vector.broadcast %64 : f32 to vector<8x128xf32>
    %87 = arith.select %68, %85, %86 : vector<8x128xi1>, vector<8x128xf32>
    %88 = vector.broadcast %59 : f32 to vector<8x128xf32>
    %89 = vector.broadcast %61 : f32 to vector<8x128xf32>
    %90 = arith.select %68, %88, %89 : vector<8x128xi1>, vector<8x128xf32>
    %91 = vector.broadcast %60 : f32 to vector<8x128xf32>
    %92 = vector.broadcast %62 : f32 to vector<8x128xf32>
    %93 = arith.select %68, %91, %92 : vector<8x128xi1>, vector<8x128xf32>
    %94 = arith.mulf %84, %49 : vector<8x128xf32>
    %95 = arith.mulf %87, %56 : vector<8x128xf32>
    %96 = arith.subf %94, %95 : vector<8x128xf32>
    %97 = arith.mulf %90, %78 : vector<8x128xf32>
    %98 = arith.addf %96, %97 : vector<8x128xf32>
    %99 = arith.mulf %93, %81 : vector<8x128xf32>
    %100 = arith.subf %98, %99 : vector<8x128xf32>
    %101 = arith.mulf %84, %56 : vector<8x128xf32>
    %102 = arith.mulf %87, %49 : vector<8x128xf32>
    %103 = arith.addf %101, %102 : vector<8x128xf32>
    %104 = arith.mulf %90, %81 : vector<8x128xf32>
    %105 = arith.addf %103, %104 : vector<8x128xf32>
    %106 = arith.mulf %93, %78 : vector<8x128xf32>
    %107 = arith.addf %105, %106 : vector<8x128xf32>
    %cst = arith.constant dense<true> : vector<8x128xi1>
    %108 = arith.xori %17, %cst : vector<8x128xi1>
    %c64_i32_20 = arith.constant 64 : i32
    %109 = tpu.dynamic_rotate %100 by %c64_i32_20 dim 1 : vector<8x128xf32>, i32 -> vector<8x128xf32>
    %c64_i32_21 = arith.constant 64 : i32
    %110 = tpu.dynamic_rotate %100 by %c64_i32_21 dim 1 : vector<8x128xf32>, i32 -> vector<8x128xf32>
    %111 = arith.select %75, %109, %110 : vector<8x128xi1>, vector<8x128xf32>
    %c64_i32_22 = arith.constant 64 : i32
    %112 = tpu.dynamic_rotate %107 by %c64_i32_22 dim 1 : vector<8x128xf32>, i32 -> vector<8x128xf32>
    %c64_i32_23 = arith.constant 64 : i32
    %113 = tpu.dynamic_rotate %107 by %c64_i32_23 dim 1 : vector<8x128xf32>, i32 -> vector<8x128xf32>
    %114 = arith.select %75, %112, %113 : vector<8x128xi1>, vector<8x128xf32>
    %115 = arith.select %108, %111, %100 : vector<8x128xi1>, vector<8x128xf32>
    %116 = arith.select %108, %114, %107 : vector<8x128xi1>, vector<8x128xf32>
    %c16 = arith.constant 16 : index
    %117 = memref.load %arg3[%c16] : memref<40xf32, #tpu.memory_space<smem>>
    %c17 = arith.constant 17 : index
    %118 = memref.load %arg3[%c17] : memref<40xf32, #tpu.memory_space<smem>>
    %c18 = arith.constant 18 : index
    %119 = memref.load %arg3[%c18] : memref<40xf32, #tpu.memory_space<smem>>
    %c19 = arith.constant 19 : index
    %120 = memref.load %arg3[%c19] : memref<40xf32, #tpu.memory_space<smem>>
    %c20 = arith.constant 20 : index
    %121 = memref.load %arg3[%c20] : memref<40xf32, #tpu.memory_space<smem>>
    %c21 = arith.constant 21 : index
    %122 = memref.load %arg3[%c21] : memref<40xf32, #tpu.memory_space<smem>>
    %c22 = arith.constant 22 : index
    %123 = memref.load %arg3[%c22] : memref<40xf32, #tpu.memory_space<smem>>
    %c23 = arith.constant 23 : index
    %124 = memref.load %arg3[%c23] : memref<40xf32, #tpu.memory_space<smem>>
    %c32_i32 = arith.constant 32 : i32
    %125 = vector.broadcast %c32_i32 : i32 to vector<8x128xi32>
    %126 = arith.andi %1, %125 : vector<8x128xi32>
    %c0_i32_24 = arith.constant 0 : i32
    %127 = vector.broadcast %c0_i32_24 : i32 to vector<8x128xi32>
    %128 = arith.cmpi eq, %126, %127 : vector<8x128xi32>
    %c32_i32_25 = arith.constant 32 : i32
    %129 = vector.broadcast %c32_i32_25 : i32 to vector<8x128xi32>
    %130 = arith.addi %1, %129 : vector<8x128xi32>
    %c32_i32_26 = arith.constant 32 : i32
    %131 = vector.broadcast %c32_i32_26 : i32 to vector<8x128xi32>
    %132 = arith.subi %1, %131 : vector<8x128xi32>
    %133 = arith.select %128, %130, %132 : vector<8x128xi1>, vector<8x128xi32>
    %c32_i32_27 = arith.constant 32 : i32
    %134 = tpu.dynamic_rotate %1 by %c32_i32_27 dim 1 : vector<8x128xi32>, i32 -> vector<8x128xi32>
    %135 = arith.cmpi eq, %134, %133 : vector<8x128xi32>
    %c32_i32_28 = arith.constant 32 : i32
    %136 = tpu.dynamic_rotate %115 by %c32_i32_28 dim 1 : vector<8x128xf32>, i32 -> vector<8x128xf32>
    %c96_i32 = arith.constant 96 : i32
    %137 = tpu.dynamic_rotate %115 by %c96_i32 dim 1 : vector<8x128xf32>, i32 -> vector<8x128xf32>
    %138 = arith.select %135, %136, %137 : vector<8x128xi1>, vector<8x128xf32>
    %c32_i32_29 = arith.constant 32 : i32
    %139 = tpu.dynamic_rotate %116 by %c32_i32_29 dim 1 : vector<8x128xf32>, i32 -> vector<8x128xf32>
    %c96_i32_30 = arith.constant 96 : i32
    %140 = tpu.dynamic_rotate %116 by %c96_i32_30 dim 1 : vector<8x128xf32>, i32 -> vector<8x128xf32>
    %141 = arith.select %135, %139, %140 : vector<8x128xi1>, vector<8x128xf32>
    %142 = vector.broadcast %117 : f32 to vector<8x128xf32>
    %143 = vector.broadcast %123 : f32 to vector<8x128xf32>
    %144 = arith.select %128, %142, %143 : vector<8x128xi1>, vector<8x128xf32>
    %145 = vector.broadcast %118 : f32 to vector<8x128xf32>
    %146 = vector.broadcast %124 : f32 to vector<8x128xf32>
    %147 = arith.select %128, %145, %146 : vector<8x128xi1>, vector<8x128xf32>
    %148 = vector.broadcast %119 : f32 to vector<8x128xf32>
    %149 = vector.broadcast %121 : f32 to vector<8x128xf32>
    %150 = arith.select %128, %148, %149 : vector<8x128xi1>, vector<8x128xf32>
    %151 = vector.broadcast %120 : f32 to vector<8x128xf32>
    %152 = vector.broadcast %122 : f32 to vector<8x128xf32>
    %153 = arith.select %128, %151, %152 : vector<8x128xi1>, vector<8x128xf32>
    %154 = arith.mulf %144, %115 : vector<8x128xf32>
    %155 = arith.mulf %147, %116 : vector<8x128xf32>
    %156 = arith.subf %154, %155 : vector<8x128xf32>
    %157 = arith.mulf %150, %138 : vector<8x128xf32>
    %158 = arith.addf %156, %157 : vector<8x128xf32>
    %159 = arith.mulf %153, %141 : vector<8x128xf32>
    %160 = arith.subf %158, %159 : vector<8x128xf32>
    %161 = arith.mulf %144, %116 : vector<8x128xf32>
    %162 = arith.mulf %147, %115 : vector<8x128xf32>
    %163 = arith.addf %161, %162 : vector<8x128xf32>
    %164 = arith.mulf %150, %141 : vector<8x128xf32>
    %165 = arith.addf %163, %164 : vector<8x128xf32>
    %166 = arith.mulf %153, %138 : vector<8x128xf32>
    %167 = arith.addf %165, %166 : vector<8x128xf32>
    %cst_31 = arith.constant dense<true> : vector<8x128xi1>
    %168 = arith.xori %68, %cst_31 : vector<8x128xi1>
    %c32_i32_32 = arith.constant 32 : i32
    %169 = tpu.dynamic_rotate %160 by %c32_i32_32 dim 1 : vector<8x128xf32>, i32 -> vector<8x128xf32>
    %c96_i32_33 = arith.constant 96 : i32
    %170 = tpu.dynamic_rotate %160 by %c96_i32_33 dim 1 : vector<8x128xf32>, i32 -> vector<8x128xf32>
    %171 = arith.select %135, %169, %170 : vector<8x128xi1>, vector<8x128xf32>
    %c32_i32_34 = arith.constant 32 : i32
    %172 = tpu.dynamic_rotate %167 by %c32_i32_34 dim 1 : vector<8x128xf32>, i32 -> vector<8x128xf32>
    %c96_i32_35 = arith.constant 96 : i32
    %173 = tpu.dynamic_rotate %167 by %c96_i32_35 dim 1 : vector<8x128xf32>, i32 -> vector<8x128xf32>
    %174 = arith.select %135, %172, %173 : vector<8x128xi1>, vector<8x128xf32>
    %175 = arith.select %168, %171, %160 : vector<8x128xi1>, vector<8x128xf32>
    %176 = arith.select %168, %174, %167 : vector<8x128xi1>, vector<8x128xf32>
    %c24 = arith.constant 24 : index
    %177 = memref.load %arg3[%c24] : memref<40xf32, #tpu.memory_space<smem>>
    %c25 = arith.constant 25 : index
    %178 = memref.load %arg3[%c25] : memref<40xf32, #tpu.memory_space<smem>>
    %c26 = arith.constant 26 : index
    %179 = memref.load %arg3[%c26] : memref<40xf32, #tpu.memory_space<smem>>
    %c27 = arith.constant 27 : index
    %180 = memref.load %arg3[%c27] : memref<40xf32, #tpu.memory_space<smem>>
    %c28 = arith.constant 28 : index
    %181 = memref.load %arg3[%c28] : memref<40xf32, #tpu.memory_space<smem>>
    %c29 = arith.constant 29 : index
    %182 = memref.load %arg3[%c29] : memref<40xf32, #tpu.memory_space<smem>>
    %c30 = arith.constant 30 : index
    %183 = memref.load %arg3[%c30] : memref<40xf32, #tpu.memory_space<smem>>
    %c31 = arith.constant 31 : index
    %184 = memref.load %arg3[%c31] : memref<40xf32, #tpu.memory_space<smem>>
    %c16_i32 = arith.constant 16 : i32
    %185 = vector.broadcast %c16_i32 : i32 to vector<8x128xi32>
    %186 = arith.andi %1, %185 : vector<8x128xi32>
    %c0_i32_36 = arith.constant 0 : i32
    %187 = vector.broadcast %c0_i32_36 : i32 to vector<8x128xi32>
    %188 = arith.cmpi eq, %186, %187 : vector<8x128xi32>
    %c16_i32_37 = arith.constant 16 : i32
    %189 = vector.broadcast %c16_i32_37 : i32 to vector<8x128xi32>
    %190 = arith.addi %1, %189 : vector<8x128xi32>
    %c16_i32_38 = arith.constant 16 : i32
    %191 = vector.broadcast %c16_i32_38 : i32 to vector<8x128xi32>
    %192 = arith.subi %1, %191 : vector<8x128xi32>
    %193 = arith.select %188, %190, %192 : vector<8x128xi1>, vector<8x128xi32>
    %c16_i32_39 = arith.constant 16 : i32
    %194 = tpu.dynamic_rotate %1 by %c16_i32_39 dim 1 : vector<8x128xi32>, i32 -> vector<8x128xi32>
    %195 = arith.cmpi eq, %194, %193 : vector<8x128xi32>
    %c16_i32_40 = arith.constant 16 : i32
    %196 = tpu.dynamic_rotate %175 by %c16_i32_40 dim 1 : vector<8x128xf32>, i32 -> vector<8x128xf32>
    %c112_i32 = arith.constant 112 : i32
    %197 = tpu.dynamic_rotate %175 by %c112_i32 dim 1 : vector<8x128xf32>, i32 -> vector<8x128xf32>
    %198 = arith.select %195, %196, %197 : vector<8x128xi1>, vector<8x128xf32>
    %c16_i32_41 = arith.constant 16 : i32
    %199 = tpu.dynamic_rotate %176 by %c16_i32_41 dim 1 : vector<8x128xf32>, i32 -> vector<8x128xf32>
    %c112_i32_42 = arith.constant 112 : i32
    %200 = tpu.dynamic_rotate %176 by %c112_i32_42 dim 1 : vector<8x128xf32>, i32 -> vector<8x128xf32>
    %201 = arith.select %195, %199, %200 : vector<8x128xi1>, vector<8x128xf32>
    %202 = vector.broadcast %177 : f32 to vector<8x128xf32>
    %203 = vector.broadcast %183 : f32 to vector<8x128xf32>
    %204 = arith.select %188, %202, %203 : vector<8x128xi1>, vector<8x128xf32>
    %205 = vector.broadcast %178 : f32 to vector<8x128xf32>
    %206 = vector.broadcast %184 : f32 to vector<8x128xf32>
    %207 = arith.select %188, %205, %206 : vector<8x128xi1>, vector<8x128xf32>
    %208 = vector.broadcast %179 : f32 to vector<8x128xf32>
    %209 = vector.broadcast %181 : f32 to vector<8x128xf32>
    %210 = arith.select %188, %208, %209 : vector<8x128xi1>, vector<8x128xf32>
    %211 = vector.broadcast %180 : f32 to vector<8x128xf32>
    %212 = vector.broadcast %182 : f32 to vector<8x128xf32>
    %213 = arith.select %188, %211, %212 : vector<8x128xi1>, vector<8x128xf32>
    %214 = arith.mulf %204, %175 : vector<8x128xf32>
    %215 = arith.mulf %207, %176 : vector<8x128xf32>
    %216 = arith.subf %214, %215 : vector<8x128xf32>
    %217 = arith.mulf %210, %198 : vector<8x128xf32>
    %218 = arith.addf %216, %217 : vector<8x128xf32>
    %219 = arith.mulf %213, %201 : vector<8x128xf32>
    %220 = arith.subf %218, %219 : vector<8x128xf32>
    %221 = arith.mulf %204, %176 : vector<8x128xf32>
    %222 = arith.mulf %207, %175 : vector<8x128xf32>
    %223 = arith.addf %221, %222 : vector<8x128xf32>
    %224 = arith.mulf %210, %201 : vector<8x128xf32>
    %225 = arith.addf %223, %224 : vector<8x128xf32>
    %226 = arith.mulf %213, %198 : vector<8x128xf32>
    %227 = arith.addf %225, %226 : vector<8x128xf32>
    %cst_43 = arith.constant dense<true> : vector<8x128xi1>
    %228 = arith.xori %128, %cst_43 : vector<8x128xi1>
    %c16_i32_44 = arith.constant 16 : i32
    %229 = tpu.dynamic_rotate %220 by %c16_i32_44 dim 1 : vector<8x128xf32>, i32 -> vector<8x128xf32>
    %c112_i32_45 = arith.constant 112 : i32
    %230 = tpu.dynamic_rotate %220 by %c112_i32_45 dim 1 : vector<8x128xf32>, i32 -> vector<8x128xf32>
    %231 = arith.select %195, %229, %230 : vector<8x128xi1>, vector<8x128xf32>
    %c16_i32_46 = arith.constant 16 : i32
    %232 = tpu.dynamic_rotate %227 by %c16_i32_46 dim 1 : vector<8x128xf32>, i32 -> vector<8x128xf32>
    %c112_i32_47 = arith.constant 112 : i32
    %233 = tpu.dynamic_rotate %227 by %c112_i32_47 dim 1 : vector<8x128xf32>, i32 -> vector<8x128xf32>
    %234 = arith.select %195, %232, %233 : vector<8x128xi1>, vector<8x128xf32>
    %235 = arith.select %228, %231, %220 : vector<8x128xi1>, vector<8x128xf32>
    %236 = arith.select %228, %234, %227 : vector<8x128xi1>, vector<8x128xf32>
    %c32 = arith.constant 32 : index
    %237 = memref.load %arg3[%c32] : memref<40xf32, #tpu.memory_space<smem>>
    %c33 = arith.constant 33 : index
    %238 = memref.load %arg3[%c33] : memref<40xf32, #tpu.memory_space<smem>>
    %c34 = arith.constant 34 : index
    %239 = memref.load %arg3[%c34] : memref<40xf32, #tpu.memory_space<smem>>
    %c35 = arith.constant 35 : index
    %240 = memref.load %arg3[%c35] : memref<40xf32, #tpu.memory_space<smem>>
    %c36 = arith.constant 36 : index
    %241 = memref.load %arg3[%c36] : memref<40xf32, #tpu.memory_space<smem>>
    %c37 = arith.constant 37 : index
    %242 = memref.load %arg3[%c37] : memref<40xf32, #tpu.memory_space<smem>>
    %c38 = arith.constant 38 : index
    %243 = memref.load %arg3[%c38] : memref<40xf32, #tpu.memory_space<smem>>
    %c39 = arith.constant 39 : index
    %244 = memref.load %arg3[%c39] : memref<40xf32, #tpu.memory_space<smem>>
    %c8_i32 = arith.constant 8 : i32
    %245 = vector.broadcast %c8_i32 : i32 to vector<8x128xi32>
    %246 = arith.andi %1, %245 : vector<8x128xi32>
    %c0_i32_48 = arith.constant 0 : i32
    %247 = vector.broadcast %c0_i32_48 : i32 to vector<8x128xi32>
    %248 = arith.cmpi eq, %246, %247 : vector<8x128xi32>
    %c8_i32_49 = arith.constant 8 : i32
    %249 = vector.broadcast %c8_i32_49 : i32 to vector<8x128xi32>
    %250 = arith.addi %1, %249 : vector<8x128xi32>
    %c8_i32_50 = arith.constant 8 : i32
    %251 = vector.broadcast %c8_i32_50 : i32 to vector<8x128xi32>
    %252 = arith.subi %1, %251 : vector<8x128xi32>
    %253 = arith.select %248, %250, %252 : vector<8x128xi1>, vector<8x128xi32>
    %c8_i32_51 = arith.constant 8 : i32
    %254 = tpu.dynamic_rotate %1 by %c8_i32_51 dim 1 : vector<8x128xi32>, i32 -> vector<8x128xi32>
    %255 = arith.cmpi eq, %254, %253 : vector<8x128xi32>
    %c8_i32_52 = arith.constant 8 : i32
    %256 = tpu.dynamic_rotate %235 by %c8_i32_52 dim 1 : vector<8x128xf32>, i32 -> vector<8x128xf32>
    %c120_i32 = arith.constant 120 : i32
    %257 = tpu.dynamic_rotate %235 by %c120_i32 dim 1 : vector<8x128xf32>, i32 -> vector<8x128xf32>
    %258 = arith.select %255, %256, %257 : vector<8x128xi1>, vector<8x128xf32>
    %c8_i32_53 = arith.constant 8 : i32
    %259 = tpu.dynamic_rotate %236 by %c8_i32_53 dim 1 : vector<8x128xf32>, i32 -> vector<8x128xf32>
    %c120_i32_54 = arith.constant 120 : i32
    %260 = tpu.dynamic_rotate %236 by %c120_i32_54 dim 1 : vector<8x128xf32>, i32 -> vector<8x128xf32>
    %261 = arith.select %255, %259, %260 : vector<8x128xi1>, vector<8x128xf32>
    %262 = vector.broadcast %237 : f32 to vector<8x128xf32>
    %263 = vector.broadcast %243 : f32 to vector<8x128xf32>
    %264 = arith.select %248, %262, %263 : vector<8x128xi1>, vector<8x128xf32>
    %265 = vector.broadcast %238 : f32 to vector<8x128xf32>
    %266 = vector.broadcast %244 : f32 to vector<8x128xf32>
    %267 = arith.select %248, %265, %266 : vector<8x128xi1>, vector<8x128xf32>
    %268 = vector.broadcast %239 : f32 to vector<8x128xf32>
    %269 = vector.broadcast %241 : f32 to vector<8x128xf32>
    %270 = arith.select %248, %268, %269 : vector<8x128xi1>, vector<8x128xf32>
    %271 = vector.broadcast %240 : f32 to vector<8x128xf32>
    %272 = vector.broadcast %242 : f32 to vector<8x128xf32>
    %273 = arith.select %248, %271, %272 : vector<8x128xi1>, vector<8x128xf32>
    %274 = arith.mulf %264, %235 : vector<8x128xf32>
    %275 = arith.mulf %267, %236 : vector<8x128xf32>
    %276 = arith.subf %274, %275 : vector<8x128xf32>
    %277 = arith.mulf %270, %258 : vector<8x128xf32>
    %278 = arith.addf %276, %277 : vector<8x128xf32>
    %279 = arith.mulf %273, %261 : vector<8x128xf32>
    %280 = arith.subf %278, %279 : vector<8x128xf32>
    %281 = arith.mulf %264, %236 : vector<8x128xf32>
    %282 = arith.mulf %267, %235 : vector<8x128xf32>
    %283 = arith.addf %281, %282 : vector<8x128xf32>
    %284 = arith.mulf %270, %261 : vector<8x128xf32>
    %285 = arith.addf %283, %284 : vector<8x128xf32>
    %286 = arith.mulf %273, %258 : vector<8x128xf32>
    %287 = arith.addf %285, %286 : vector<8x128xf32>
    %cst_55 = arith.constant dense<true> : vector<8x128xi1>
    %288 = arith.xori %188, %cst_55 : vector<8x128xi1>
    %c8_i32_56 = arith.constant 8 : i32
    %289 = tpu.dynamic_rotate %280 by %c8_i32_56 dim 1 : vector<8x128xf32>, i32 -> vector<8x128xf32>
    %c120_i32_57 = arith.constant 120 : i32
    %290 = tpu.dynamic_rotate %280 by %c120_i32_57 dim 1 : vector<8x128xf32>, i32 -> vector<8x128xf32>
    %291 = arith.select %255, %289, %290 : vector<8x128xi1>, vector<8x128xf32>
    %c8_i32_58 = arith.constant 8 : i32
    %292 = tpu.dynamic_rotate %287 by %c8_i32_58 dim 1 : vector<8x128xf32>, i32 -> vector<8x128xf32>
    %c120_i32_59 = arith.constant 120 : i32
    %293 = tpu.dynamic_rotate %287 by %c120_i32_59 dim 1 : vector<8x128xf32>, i32 -> vector<8x128xf32>
    %294 = arith.select %255, %292, %293 : vector<8x128xi1>, vector<8x128xf32>
    %295 = arith.select %288, %291, %280 : vector<8x128xi1>, vector<8x128xf32>
    %296 = arith.select %288, %294, %287 : vector<8x128xi1>, vector<8x128xf32>
    %c0_60 = arith.constant 0 : index
    %c0_61 = arith.constant 0 : index
    %c0_62 = arith.constant 0 : index
    %297 = vector.load %arg5[%c0_60, %c0_61, %c0_62] : memref<2x8x128xf32, #tpu.memory_space<vmem>>, vector<1x8x128xf32>
    %298 = vector.shape_cast %297 : vector<1x8x128xf32> to vector<8x128xf32>
    %299 = vector.shape_cast %295 : vector<8x128xf32> to vector<1x8x128xf32>
    tpu.vector_store %arg5[%c0_60, %c0_61, %c0_62], %299 {strides = array<i32>} : memref<2x8x128xf32, #tpu.memory_space<vmem>>, vector<1x8x128xf32>,
    %c1_63 = arith.constant 1 : index
    %c0_64 = arith.constant 0 : index
    %c0_65 = arith.constant 0 : index
    %300 = vector.load %arg5[%c1_63, %c0_64, %c0_65] : memref<2x8x128xf32, #tpu.memory_space<vmem>>, vector<1x8x128xf32>
    %301 = vector.shape_cast %300 : vector<1x8x128xf32> to vector<8x128xf32>
    %302 = vector.shape_cast %296 : vector<8x128xf32> to vector<1x8x128xf32>
    tpu.vector_store %arg5[%c1_63, %c0_64, %c0_65], %302 {strides = array<i32>} : memref<2x8x128xf32, #tpu.memory_space<vmem>>, vector<1x8x128xf32>,
    return
  }
  func.func @transform_0(%arg0: i32) -> i32 {
    %c0_i32 = arith.constant 0 : i32
    %c0_i32_0 = arith.constant 0 : i32
    return %c0_i32 : i32
  }
  func.func @transform_1(%arg0: i32) -> i32 {
    %c0_i32 = arith.constant 0 : i32
    %c0_i32_0 = arith.constant 0 : i32
    return %c0_i32 : i32
  }
  func.func @transform_2(%arg0: i32) -> i32 {
    %c0_i32 = arith.constant 0 : i32
    %c0_i32_0 = arith.constant 0 : i32
    return %c0_i32 : i32
  }
  func.func @transform_3(%arg0: i32) -> (i32, i32, i32) {
    %c0_i32 = arith.constant 0 : i32
    %c0_i32_0 = arith.constant 0 : i32
    %c0_i32_1 = arith.constant 0 : i32
    return %c0_i32, %c0_i32_0, %arg0 : i32, i32, i32
  }
  func.func @transform_4(%arg0: i32) -> (i32, i32, i32) {
    %c0_i32 = arith.constant 0 : i32
    %c0_i32_0 = arith.constant 0 : i32
    %c0_i32_1 = arith.constant 0 : i32
    return %c0_i32, %c0_i32_0, %arg0 : i32, i32, i32
  }
}

</mosaic_0001>

<bundles_post_ra>
// kernel: custom-call.1
= control target key start
LH: loop header
LB: loop body
LE: loop exit
PB: predicated region body
PF: predicated region fallthrough
CT: control target
= control target key end

     0   :  { %s59_s0 = inlined_call_operand.hbm [shape: c64[2,2,2,2,2,8], index: 0, kind: input, shape index: {}]   ;;  %s60_s1 = inlined_call_operand.vmem [shape: f32[2,2,2,2,2,8], index: 1, kind: output, shape index: {}]  }
   0x1   :  { %s2_s8 = scalar_lea.hbm %s59_s0, 512 }
   0x2   :  { %3 = vsyncpa [#allocation0], 0  ;;  %s4_s11 = sshll.u32 %s60_s1, 4  ;;  %s34_s14 = scalar_lea.hbm %s59_s0, 1024  ;;  %s5_s11 = int_to_ptr.vmem [resolvable:$true] %s4_s11 }
   0x3   :  { %p11_p0 = scmp.ne.s32.totalorder %s2_s8, %s34_s14  ;;  %p13_p1 = scmp.lt.u32.totalorder %s2_s8, %s59_s0 }
   0x4   :  { %p14_p2 = scmp.lt.u32.totalorder %s34_s14, %s34_s14  ;;  %p16_p4 = scmp.lt.u32.totalorder %s34_s14, %s2_s8 }
   0x6   :  { %p15_p3 = por %p14_p2, %p13_p1 }
   0x8   :  { %p17_p5 = por %p16_p4, %p15_p3 }
   0xa   :  { %p18_p6 = pnand %p17_p5, %p11_p0 }
   0xc   :  { %21 = shalt.err (!%p18_p6)  }
   0xd   :  { %s22_s17 = scalar_lea.vmem %s5_s11, 512  ;;  %p27_p8 = scmp.lt.s32.totalorder %s5_s11, %s5_s11 }
   0xe   :  { %p23_p7 = scmp.ne.s32.totalorder %s5_s11, %s22_s17  ;;  %p28_p9 = scmp.lt.s32.totalorder %s22_s17, %s22_s17 }
  0x10   :  { %p29_p10 = por %p28_p9, %p27_p8 }
  0x12   :  { %p30_p11 = pnand %p29_p10, %p23_p7 }
  0x14   :  { %33 = shalt.err (!%p30_p11)  }
  0x15   :  { %7 = dma.hbm_to_vmem [thread:$0]  %s2_s8, 512, %s5_s11, [#allocation0] }
  0x16   :  { %35 = dma.done.wait [#allocation0], 512  }
  0x17   :  { %36 = vsyncadd [#allocation0], 4294966784 }
  0x18   :  { %9 = vsyncpa [#allocation0], 1 }

// kernel: custom-call
= control target key start
LH: loop header
LB: loop body
LE: loop exit
PB: predicated region body
PF: predicated region fallthrough
CT: control target
= control target key end

     0   :  { %2 = vsyncpa [#allocation0], 0  ;;  %s61_s0 = inlined_call_operand.hbm [shape: c64[2,2,2,2,2,8], index: 0, kind: input, shape index: {}]   ;;  %s62_s1 = inlined_call_operand.vmem [shape: f32[2,2,2,2,2,8], index: 1, kind: output, shape index: {}]  }
   0x1   :  { %s3_s8 = sshll.u32 %s62_s1, 4  ;;  %s9_s11 = scalar_lea.hbm %s61_s0, 512  ;;  %s4_s8 = int_to_ptr.vmem [resolvable:$true] %s3_s8 }
   0x2   :  { %p10_p0 = scmp.ne.s32.totalorder %s61_s0, %s9_s11  ;;  %s11_s16 = scalar_lea.hbm %s61_s0, 1024 }
   0x3   :  { %p12_p1 = scmp.lt.u32.totalorder %s11_s16, %s9_s11  ;;  %p13_p2 = scmp.lt.u32.totalorder %s9_s11, %s61_s0 }
   0x5   :  { %p14_p3 = por %p13_p2, %p12_p1 }
   0x7   :  { %p15_p4 = pnand %p14_p3, %p10_p0 }
   0x9   :  { %18 = shalt.err (!%p15_p4)  }
   0xa   :  { %s19_s1 = scalar_lea.vmem %s4_s8, 512  ;;  %p24_p6 = scmp.lt.s32.totalorder %s4_s8, %s4_s8 }
   0xb   :  { %p20_p5 = scmp.ne.s32.totalorder %s4_s8, %s19_s1  ;;  %p25_p7 = scmp.lt.s32.totalorder %s19_s1, %s19_s1 }
   0xd   :  { %p26_p8 = por %p25_p7, %p24_p6 }
   0xf   :  { %p27_p9 = pnand %p26_p8, %p20_p5 }
  0x11   :  { %30 = shalt.err (!%p27_p9)  }
  0x12   :  { %6 = dma.hbm_to_vmem [thread:$0]  %s61_s0, 512, %s4_s8, [#allocation0] }
  0x13   :  { %31 = dma.done.wait [#allocation0], 512  }
  0x14   :  { %32 = vsyncadd [#allocation0], 4294966784 }
  0x15   :  { %8 = vsyncpa [#allocation0], 1 }

// kernel: custom-call.2
= control target key start
LH: loop header
LB: loop body
LE: loop exit
PB: predicated region body
PF: predicated region fallthrough
CT: control target
= control target key end

     0   :  { %s126_s0 = inlined_call_operand.vmem [shape: f32[2,2,2,2,2,8], index: 0, kind: input, shape index: {}]   ;;  %s127_s1 = inlined_call_operand.vmem [shape: f32[2,2,2,2,2,8], index: 1, kind: input, shape index: {}]   ;;  %s128_s2 = inlined_call_operand.hbm [shape: c64[2,2,2,2,2,8], index: 2, kind: output, shape index: {}]  }
   0x1   :  { %s87_s11 = scalar_lea.hbm %s128_s2, 512 }
   0x2   :  { %4 = vsyncpa [#allocation0], 0  ;;  %s5_s14 = sshll.u32 %s126_s0, 4  ;;  %s6_s14 = int_to_ptr.vmem [resolvable:$true] %s5_s14 }
   0x3   :  { %s18_s15 = scalar_lea.vmem %s6_s14, 512  ;;  %p23_p1 = scmp.lt.s32.totalorder %s6_s14, %s6_s14 }
   0x4   :  { %p19_p0 = scmp.ne.s32.totalorder %s6_s14, %s18_s15  ;;  %p24_p2 = scmp.lt.s32.totalorder %s18_s15, %s18_s15 }
   0x6   :  { %p25_p3 = por %p24_p2, %p23_p1 }
   0x8   :  { %p26_p4 = pnand %p25_p3, %p19_p0 }
   0xa   :  { %29 = shalt.err (!%p26_p4)  }
   0xb   :  { %p31_p5 = scmp.ne.s32.totalorder %s128_s2, %s87_s11  ;;  %s32_s0 = scalar_lea.hbm %s128_s2, 1024 }
   0xc   :  { %p33_p6 = scmp.lt.u32.totalorder %s32_s0, %s87_s11  ;;  %p34_p7 = scmp.lt.u32.totalorder %s87_s11, %s128_s2 }
   0xe   :  { %p35_p8 = por %p34_p7, %p33_p6 }
  0x10   :  { %p36_p9 = pnand %p35_p8, %p31_p5 }
  0x12   :  { %39 = shalt.err (!%p36_p9)  }
  0x13   :  { %8 = dma.vmem_to_hbm [thread:$0]  %s6_s14, 512, %s128_s2, [#allocation0] }
  0x14   :  { %65 = dma.done.wait [#allocation0], 512  }
  0x15   :  { %66 = vsyncadd [#allocation0], 4294966784 }
  0x16   :  { %10 = vsyncpa [#allocation0], 1 }
  0x17   :  { %11 = vsyncpa [#allocation1], 0  ;;  %s12_s28 = sshll.u32 %s127_s1, 4  ;;  %s13_s28 = int_to_ptr.vmem [resolvable:$true] %s12_s28 }
  0x18   :  { %s40_s29 = scalar_lea.vmem %s13_s28, 512  ;;  %p45_p11 = scmp.lt.s32.totalorder %s13_s28, %s13_s28 }
  0x19   :  { %p41_p10 = scmp.ne.s32.totalorder %s13_s28, %s40_s29  ;;  %p46_p12 = scmp.lt.s32.totalorder %s40_s29, %s40_s29 }
  0x1b   :  { %p47_p13 = por %p46_p12, %p45_p11 }
  0x1d   :  { %p48_p0 = pnand %p47_p13, %p41_p10 }
  0x1f   :  { %51 = shalt.err (!%p48_p0)  }
  0x20   :  { %p53_p1 = scmp.ne.s32.totalorder %s87_s11, %s32_s0  ;;  %p56_p2 = scmp.lt.u32.totalorder %s32_s0, %s32_s0 }
  0x22   :  { %p57_p3 = por %p56_p2, %p34_p7 }
  0x24   :  { %p59_p4 = por %p57_p3, %p33_p6 }
  0x26   :  { %p60_p5 = pnand %p59_p4, %p53_p1 }
  0x28   :  { %63 = shalt.err (!%p60_p5)  }
  0x29   :  { %15 = dma.vmem_to_hbm [thread:$0]  %s13_s28, 512, %s87_s11, [#allocation1] }
  0x2a   :  { %67 = dma.done.wait [#allocation1], 512  }
  0x2b   :  { %68 = vsyncadd [#allocation1], 4294966784 }
  0x2c   :  { %17 = vsyncpa [#allocation1], 1 }

// kernel: _lambda_.1
= control target key start
LH: loop header
LB: loop body
LE: loop exit
PB: predicated region body
PF: predicated region fallthrough
CT: control target
= control target key end

     0   :  { %9 = vsyncpa [#allocation3], 0  ;;  %s713_s0 = inlined_call_operand.vmem [shape: f32[10], index: 0, kind: input, shape index: {}]   ;;  %s714_s1 = inlined_call_operand.vmem [shape: f32[10], index: 1, kind: input, shape index: {}]   ;;  %s715_s2 = inlined_call_operand.vmem [shape: f32[40], index: 2, kind: input, shape index: {}]   ;;  %s716_s3 = inlined_call_operand.vmem [shape: f32[2,8,128], index: 3, kind: input, shape index: {}, may-alias: {3,4}]   ;;  %s717_s4 = inlined_call_operand.vmem [shape: f32[2,8,128], index: 4, kind: output, shape index: {}, may-alias: {3,4}]  }
   0x1   :  { %10 = vsyncpa [#allocation5], 0  ;;  %s27_s17 = sshll.u32 %s714_s1, 4  ;;  %s17_s20 = sshll.u32 %s713_s0, 4  ;;  %s28_s17 = int_to_ptr.vmem [resolvable:$true] %s27_s17  ;;  %s18_s20 = int_to_ptr.vmem [resolvable:$true] %s17_s20 }
   0x2   :  { %s414_s21 = scalar_lea.vmem %s28_s17, 16  ;;  %p419_p1 = scmp.lt.s32.totalorder %s28_s17, %s28_s17 }
   0x3   :  { %p415_p0 = scmp.ne.s32.totalorder %s28_s17, %s414_s21  ;;  %p420_p2 = scmp.lt.s32.totalorder %s414_s21, %s414_s21 }
   0x5   :  { %p421_p3 = por %p420_p2, %p419_p1 }
   0x7   :  { %p422_p4 = pnand %p421_p3, %p415_p0 }
   0x9   :  { %425 = shalt.err (!%p422_p4)
}
   0xa   :  { %s454_s22 = smov [#allocation4]   ;;  %s426_s23 = scalar_lea.vmem %s18_s20, 16 }
   0xb   :  { %30 = dma.vmem_to_smem %s28_s17, 16, %s454_s22, [#allocation5]  }
   0xc   :  { %p427_p5 = scmp.ne.s32.totalorder %s18_s20, %s426_s23  ;;  %p431_p6 = scmp.lt.s32.totalorder %s18_s20, %s18_s20 }
   0xd   :  { %p432_p7 = scmp.lt.s32.totalorder %s426_s23, %s426_s23 }
   0xf   :  { %p433_p8 = por %p432_p7, %p431_p6 }
  0x11   :  { %p434_p9 = pnand %p433_p8, %p427_p5 }
  0x13   :  { %437 = shalt.err (!%p434_p9)
}
  0x14   :  { %s455_s1 = smov [#allocation2]   ;;  %s37_s25 = sshll.u32 %s715_s2, 4  ;;  %s38_s25 = int_to_ptr.vmem [resolvable:$true] %s37_s25 }
  0x15   :  { %20 = dma.vmem_to_smem %s18_s20, 16, %s455_s1, [#allocation3]  }
  0x16   :  { %s438_s26 = scalar_lea.vmem %s38_s25, 16  ;;  %p443_p11 = scmp.lt.s32.totalorder %s38_s25, %s38_s25 }
  0x17   :  { %p439_p10 = scmp.ne.s32.totalorder %s38_s25, %s438_s26  ;;  %p444_p12 = scmp.lt.s32.totalorder %s438_s26, %s438_s26 }
  0x19   :  { %p445_p13 = por %p444_p12, %p443_p11 }
  0x1b   :  { %p446_p0 = pnand %p445_p13, %p439_p10 }
  0x1d   :  { %449 = shalt.err (!%p446_p0)
}
  0x1e   :  { %s456_s27 = smov [#allocation6]  }
  0x1f   :  { %40 = dma.vmem_to_smem %s38_s25, 16, %s456_s27, [#allocation5]  }
  0x20   :  { %450 = dma.done.wait [#allocation3], 16  }
  0x21   :  { %451 = vsyncadd [#allocation3], 4294967280 }
  0x22   :  { %452 = dma.done.wait [#allocation5], 32  }
  0x23   :  { %453 = vsyncadd [#allocation5], 4294967264 }
  0x24   :  { %52 = sfence }
  0x25   :  { %v53_v0 = vlaneseq  ;;  %s499_s28 = sld [smem:[#allocation6]]  ;;  %s501_s29 = sld [smem:[#allocation6 + $0x1]]  ;;  %v57_v1 = vld [vmem:[%s716_s3] sm:$0xff]  ;;  %v358_v3 = vld [vmem:[%s716_s3 + $0x8] sm:$0xff]  ;;  %vm459_vm3 = vmmov 1  }
  0x26   :  { %s506_s5 = sld [smem:[#allocation6 + $0x2]]  ;;  %s508_s6 = sld [smem:[#allocation6 + $0x3]]  ;;  %v75_v9 = vrot.slane %v57_v1, 7  ;;  %v76_v10 = vrot.slane %v57_v1, 1  ;;  %v78_v11 = vrot.slane %v358_v3, 7  ;;  %v79_v12 = vrot.slane %v358_v3, 1 }
  0x27   :  { %v54_v2 = vshrl.u32 %v53_v0, 7  ;;  %s513_s9 = sld [smem:[#allocation6 + $0x4]]  ;;  %s515_s10 = sld [smem:[#allocation6 + $0x5]]  ;;  %v517_v4 = vand.u32 127, %v53_v0 }
  0x28   :  { %s364_s11 = sld [smem:[#allocation6 + $0x6]]  ;;  %s365_s12 = sld [smem:[#allocation6 + $0x7]] }
  0x29   :  { %v68_v5 = vand.u32 1, %v54_v2  ;;  %v70_v6 = vadd.s32 1, %v54_v2  ;;  %v366_v7 = vadd.s32 4294967295, %v54_v2  ;;  %v73_v8 = vrot.slane %v54_v2, 7  ;;  %s529_s3 = sld [smem:[#allocation6 + $0x8]]  ;;  %s531_s13 = sld [smem:[#allocation6 + $0x9]] }
  0x2a   :  { %v115_v21 = vand.u32 64, %v517_v4  ;;  %s373_s14 = sld [smem:[#allocation6 + $0xe]]  ;;  %s374_s15 = sld [smem:[#allocation6 + $0xf]] }
  0x2b   :  { %vm519_vm0 = vcmp.eq.s32.totalorder %v68_v5, 0  ;;  %v81_v14 = vstv %s499_s28  ;;  %v84_v16 = vstv %s501_s29  ;;  %s457_s16 = smov 64   ;;  %s458_s17 = smov 32  }
  0x2c   :  { %v72_v15 = vsel %vm519_vm0, %v70_v6, %v366_v7  ;;  %v87_v17 = vstv %s506_s5  ;;  %v90_v18 = vstv %s508_s6  ;;  %vm544_vm2 = vcmp.eq.s32.totalorder %v115_v21, 0  ;;  %s369_s18 = sld [smem:[#allocation6 + $0xa]]  ;;  %s371_s19 = sld [smem:[#allocation6 + $0xc]]  ;;  %vm147_vm4 = vmxor %vm519_vm0, %vm459_vm3 }
  0x2d   :  { %vm74_vm1 = vcmp.eq.s32.totalorder %v73_v8, %v72_v15  ;;  %v88_v19 = vstv %s513_s9  ;;  %v91_v20 = vstv %s515_s10  ;;  %s370_s20 = sld [smem:[#allocation6 + $0xb]]  ;;  %s372_s21 = sld [smem:[#allocation6 + $0xd]]  ;;  %vm606_vm7 = vmxor %vm544_vm2, %vm459_vm3 }
  0x2e   :  { %v77_v22 = vsel %vm74_vm1, %v75_v9, %v76_v10  ;;  %v80_v23 = vsel %vm74_vm1, %v78_v11, %v79_v12  ;;  %v82_v24 = vstv %s364_s11  ;;  %v85_v25 = vstv %s365_s12  ;;  %s375_s22 = sld [smem:[#allocation6 + $0x10]]  ;;  %s381_s23 = sld [smem:[#allocation6 + $0x16]] }
  0x2f   :  { %v83_v26 = vsel %vm519_vm0, %v81_v14, %v82_v24  ;;  %v86_v27 = vsel %vm519_vm0, %v84_v16, %v85_v25  ;;  %v89_v28 = vsel %vm519_vm0, %v87_v17, %v88_v19  ;;  %v92_v29 = vsel %vm519_vm0, %v90_v18, %v91_v20  ;;  %s376_s1 = sld [smem:[#allocation6 + $0x11]]  ;;  %s382_s0 = sld [smem:[#allocation6 + $0x17]] }
  0x30   :  { %v93_v30 = vmul.f32 %v83_v26, %v57_v1  ;;  %v94_v31 = vmul.f32 %v358_v3, %v86_v27  ;;  %v96_v32 = vmul.f32 %v89_v28, %v77_v22  ;;  %v100_v33 = vmul.f32 %v358_v3, %v83_v26  ;;  %s460_s24 = smov 96   ;;  %s377_s25 = sld [smem:[#allocation6 + $0x12]] }
  0x31   :  { %v101_v34 = vmul.f32 %v86_v27, %v57_v1  ;;  %v103_v35 = vmul.f32 %v89_v28, %v80_v23  ;;  %v98_v37 = vmul.f32 %v92_v29, %v80_v23  ;;  %v105_v40 = vmul.f32 %v92_v29, %v77_v22  ;;  %s379_s26 = sld [smem:[#allocation6 + $0x14]]  ;;  %s378_s27 = sld [smem:[#allocation6 + $0x13]] }
  0x32   :  { %v95_v36 = vsub.f32 %v93_v30, %v94_v31  ;;  %v121_v41 = vstv %s529_s3  ;;  %v122_v43 = vstv %s373_s14  ;;  %v124_v44 = vstv %s531_s13  ;;  %s380_s28 = sld [smem:[#allocation6 + $0x15]]  ;;  %s461_s29 = smov 16  }
  0x33   :  { %v102_v39 = vadd.f32 %v101_v34, %v100_v33  ;;  %v123_v46 = vsel %vm544_vm2, %v121_v41, %v122_v43  ;;  %v125_v47 = vstv %s374_s15  ;;  %v127_v57 = vstv %s369_s18  ;;  %s384_s2 = sld [smem:[#allocation6 + $0x18]]  ;;  %s390_s30 = sld [smem:[#allocation6 + $0x1e]] }
  0x34   :  { %v97_v42 = vadd.f32 %v96_v32, %v95_v36  ;;  %v126_v49 = vsel %vm544_vm2, %v124_v44, %v125_v47  ;;  %v128_v58 = vstv %s371_s19  ;;  %v130_v61 = vstv %s370_s20  ;;  %s385_s5 = sld [smem:[#allocation6 + $0x19]]  ;;  %s391_s6 = sld [smem:[#allocation6 + $0x1f]] }
  0x35   :  { %v104_v45 = vadd.f32 %v103_v35, %v102_v39  ;;  %v129_v59 = vsel %vm544_vm2, %v127_v57, %v128_v58  ;;  %v131_v62 = vstv %s372_s21  ;;  %v162_v10 = vand.u32 32, %v517_v4  ;;  %s462_s7 = smov 112   ;;  %s386_s8 = sld [smem:[#allocation6 + $0x1a]] }
  0x36   :  { %v99_v48 = vsub.f32 %v97_v42, %v98_v37  ;;  %v132_v0 = vsel %vm544_vm2, %v130_v61, %v131_v62  ;;  %v180_v12 = vstv %s375_s22  ;;  %v181_v14 = vstv %s381_s23  ;;  %s388_s9 = sld [smem:[#allocation6 + $0x1c]]  ;;  %s387_s10 = sld [smem:[#allocation6 + $0x1b]] }
  0x37   :  { %v106_v50 = vadd.f32 %v105_v40, %v104_v45  ;;  %vm568_vm5 = vcmp.eq.s32.totalorder %v162_v10, 0  ;;  %v183_v15 = vstv %s376_s1  ;;  %v184_v16 = vstv %s382_s0  ;;  %s389_s11 = sld [smem:[#allocation6 + $0x1d]]  ;;  %s463_s12 = smov 8  }
  0x38   :  { %117 = vrot.lane.b32.xlu0 %v99_v48, %s457_s16  ;;  %v141_v51 = vmul.f32 %v126_v49, %v99_v48  ;;  %v133_v52 = vmul.f32 %v123_v46, %v99_v48  ;;  %v182_v19 = vsel %vm568_vm5, %v180_v12, %v181_v14  ;;  %v185_v13 = vsel %vm568_vm5, %v183_v15, %v184_v16  ;;  %s393_s3 = sld [smem:[#allocation6 + $0x20]]  ;;  %s399_s13 = sld [smem:[#allocation6 + $0x26]]  ;;  %vm656_vm10 = vmxor %vm568_vm5, %vm459_vm3 }
  0x39   :  { %v140_v53 = vmul.f32 %v123_v46, %v106_v50  ;;  %v134_v54 = vmul.f32 %v126_v49, %v106_v50  ;;  %v164_v28 = vadd.s32 32, %v517_v4  ;;  %v383_v29 = vadd.s32 4294967264, %v517_v4  ;;  %s394_s14 = sld [smem:[#allocation6 + $0x21]]  ;;  %s400_s15 = sld [smem:[#allocation6 + $0x27]] }
  0x3a   :  { %v186_v31 = vstv %s377_s25  ;;  %v187_v32 = vstv %s379_s26  ;;  %v189_v40 = vstv %s378_s27  ;;  %v190_v41 = vstv %s380_s28  ;;  %s397_s18 = sld [smem:[#allocation6 + $0x24]]  ;;  %s396_s19 = sld [smem:[#allocation6 + $0x23]] }
  0x3b   :  { %v142_v55 = vadd.f32 %v141_v51, %v140_v53  ;;  %v135_v56 = vsub.f32 %v133_v52, %v134_v54  ;;  %v166_v33 = vsel %vm568_vm5, %v164_v28, %v383_v29  ;;  %v188_v34 = vsel %vm568_vm5, %v186_v31, %v187_v32  ;;  %s398_s20 = sld [smem:[#allocation6 + $0x25]] }
  0x3c   :  { %119 = vrot.lane.b32.xlu0 %v106_v50, %s457_s16  ;;  %v191_v45 = vsel %vm568_vm5, %v189_v40, %v190_v41  ;;  %v227_v54 = vand.u32 16, %v517_v4  ;;  %v248_v62 = vstv %s385_s5  ;;  %v229_v15 = vadd.s32 16, %v517_v4 }
  0x3d   :  { %v392_v16 = vadd.s32 4294967280, %v517_v4  ;;  %v292_v40 = vand.u32 8, %v517_v4 }
  0x3e   :  { %vm610_vm8 = vcmp.eq.s32.totalorder %v227_v54, 0 }
  0x3f   :  { %vm660_vm11 = vcmp.eq.s32.totalorder %v292_v40, 0  ;;  %vm336_vm13 = vmxor %vm610_vm8, %vm459_vm3 }
  0x40   :  { %167 = vrot.lane.b32.xlu0 %v517_v4, %s458_s17 }
  0xaa   :  { %v118_v60 = vpop.permute.xlu0 %117 }
  0xab   :  { %v136_v63 = vmul.f32 %v129_v59, %v118_v60  ;;  %v145_v8 = vmul.f32 %v132_v0, %v118_v60  ;;  %v246_v60 = vstv %s390_s30 }
  0xad   :  { %v137_v5 = vadd.f32 %v136_v63, %v135_v56  ;;  %v249_v63 = vstv %s391_s6 }
  0xae   :  { %v120_v1 = vpop.permute.xlu0 %119 }
  0xaf   :  { %v138_v2 = vmul.f32 %v132_v0, %v120_v1  ;;  %v143_v3 = vmul.f32 %v129_v59, %v120_v1  ;;  %v245_v59 = vstv %s384_s2  ;;  %v250_v1 = vsel %vm610_vm8, %v248_v62, %v249_v63 }
  0xb0   :  { %v247_v0 = vsel %vm610_vm8, %v245_v59, %v246_v60  ;;  %v294_v63 = vadd.s32 8, %v517_v4 }
  0xb1   :  { %v144_v6 = vadd.f32 %v143_v3, %v142_v55  ;;  %v139_v7 = vsub.f32 %v137_v5, %v138_v2 }
  0xb2   :  { %v168_v30 = vpop.permute.xlu0 %167 }
  0xb3   :  { %148 = vrot.lane.b32.xlu1 %v139_v7, %s457_s16  ;;  %v146_v9 = vadd.f32 %v145_v8, %v144_v6  ;;  %vm586_vm6 = vcmp.eq.s32.totalorder %v168_v30, %v166_v33 }
  0xb7   :  { %150 = vrot.lane.b32.xlu1 %v146_v9, %s457_s16  ;;  %s464_s16 = smov 120  }
 0x125   :  { %v149_v17 = vpop.permute.xlu1 %148 }
 0x126   :  { %v152_v18 = vsel %vm147_vm4, %v149_v17, %v139_v7 }
 0x127   :  { %172 = vrot.lane.b32.xlu0 %v152_v18, %s460_s24  ;;  %170 = vrot.lane.b32.xlu1 %v152_v18, %s458_s17  ;;  %v192_v21 = vmul.f32 %v182_v19, %v152_v18  ;;  %v200_v23 = vmul.f32 %v185_v13, %v152_v18  ;;  %v251_v18 = vstv %s386_s8 }
 0x129   :  { %v151_v20 = vpop.permute.xlu1 %150 }
 0x12a   :  { %v153_v22 = vsel %vm147_vm4, %v151_v20, %v146_v9 }
 0x12b   :  { %v193_v24 = vmul.f32 %v185_v13, %v153_v22  ;;  %v199_v25 = vmul.f32 %v182_v19, %v153_v22  ;;  %177 = vrot.lane.b32.xlu0 %v153_v22, %s460_s24  ;;  %175 = vrot.lane.b32.xlu1 %v153_v22, %s458_s17  ;;  %v252_v19 = vstv %s388_s9  ;;  %v231_v13 = vsel %vm610_vm8, %v229_v15, %v392_v16 }
 0x12c   :  { %v253_v20 = vsel %vm610_vm8, %v251_v18, %v252_v19 }
 0x12d   :  { %v194_v26 = vsub.f32 %v192_v21, %v193_v24  ;;  %v201_v27 = vadd.f32 %v200_v23, %v199_v25  ;;  %v254_v25 = vstv %s387_s10 }
 0x199   :  { %v173_v36 = vpop.permute.xlu0 %172  ;;  %v171_v37 = vpop.permute.xlu1 %170 }
 0x19a   :  { %v174_v39 = vsel %vm586_vm6, %v171_v37, %v173_v36 }
 0x19b   :  { %v195_v42 = vmul.f32 %v188_v34, %v174_v39  ;;  %v204_v52 = vmul.f32 %v191_v45, %v174_v39 }
 0x19d   :  { %v178_v43 = vpop.permute.xlu0 %177  ;;  %v176_v44 = vpop.permute.xlu1 %175  ;;  %v196_v47 = vadd.f32 %v195_v42, %v194_v26  ;;  %v255_v26 = vstv %s389_s11 }
 0x19e   :  { %v179_v46 = vsel %vm586_vm6, %v176_v44, %v178_v43  ;;  %v256_v30 = vsel %vm610_vm8, %v254_v25, %v255_v26 }
 0x19f   :  { %v197_v48 = vmul.f32 %v191_v45, %v179_v46  ;;  %v202_v49 = vmul.f32 %v188_v34, %v179_v46  ;;  %v310_v45 = vstv %s393_s3  ;;  %v311_v46 = vstv %s399_s13 }
 0x1a1   :  { %v203_v50 = vadd.f32 %v202_v49, %v201_v27  ;;  %v198_v51 = vsub.f32 %v196_v47, %v197_v48  ;;  %v313_v48 = vstv %s394_s14  ;;  %v314_v49 = vstv %s400_s15 }
 0x1a3   :  { %209 = vrot.lane.b32.xlu0 %v198_v51, %s460_s24  ;;  %207 = vrot.lane.b32.xlu1 %v198_v51, %s458_s17  ;;  %v205_v53 = vadd.f32 %v204_v52, %v203_v50  ;;  %v312_v50 = vsel %vm660_vm11, %v310_v45, %v311_v46 }
 0x1a7   :  { %214 = vrot.lane.b32.xlu0 %v205_v53, %s460_s24  ;;  %212 = vrot.lane.b32.xlu1 %v205_v53, %s458_s17  ;;  %s395_s17 = sld [smem:[#allocation6 + $0x22]] }
 0x1ab   :  { %232 = vrot.lane.b32.xlu1 %v517_v4, %s461_s29 }
 0x215   :  { %v210_v56 = vpop.permute.xlu0 %209  ;;  %v208_v57 = vpop.permute.xlu1 %207 }
 0x216   :  { %v211_v61 = vsel %vm586_vm6, %v208_v57, %v210_v56 }
 0x217   :  { %v217_v38 = vsel %vm606_vm7, %v211_v61, %v198_v51  ;;  %v315_v51 = vsel %vm660_vm11, %v313_v48, %v314_v49 }
 0x218   :  { %237 = vrot.lane.b32.xlu1 %v217_v38, %s462_s7  ;;  %235 = vrot.lane.b32.xlu0 %v217_v38, %s461_s29  ;;  %v257_v6 = vmul.f32 %v247_v0, %v217_v38  ;;  %v265_v8 = vmul.f32 %v250_v1, %v217_v38  ;;  %v401_v38 = vadd.s32 4294967288, %v517_v4 }
 0x219   :  { %v215_v2 = vpop.permute.xlu0 %214  ;;  %v213_v3 = vpop.permute.xlu1 %212 }
 0x21a   :  { %v216_v5 = vsel %vm586_vm6, %v213_v3, %v215_v2  ;;  %v317_v2 = vstv %s397_s18  ;;  %v296_v3 = vsel %vm660_vm11, %v294_v63, %v401_v38 }
 0x21b   :  { %v218_v7 = vsel %vm606_vm7, %v216_v5, %v205_v53 }
 0x21c   :  { %242 = vrot.lane.b32.xlu1 %v218_v7, %s462_s7  ;;  %v258_v9 = vmul.f32 %v250_v1, %v218_v7  ;;  %v264_v10 = vmul.f32 %v247_v0, %v218_v7  ;;  %240 = vrot.lane.b32.xlu0 %v218_v7, %s461_s29  ;;  %v316_v1 = vstv %s395_s17 }
 0x21d   :  { %v233_v17 = vpop.permute.xlu1 %232  ;;  %v318_v5 = vsel %vm660_vm11, %v316_v1, %v317_v2 }
 0x21e   :  { %v259_v12 = vsub.f32 %v257_v6, %v258_v9  ;;  %v266_v14 = vadd.f32 %v265_v8, %v264_v10  ;;  %vm636_vm9 = vcmp.eq.s32.totalorder %v233_v17, %v231_v13  ;;  %v319_v9 = vstv %s396_s19 }
 0x21f   :  { %v320_v10 = vstv %s398_s20 }
 0x220   :  { %v321_v16 = vsel %vm660_vm11, %v319_v9, %v320_v10 }
 0x28a   :  { %v236_v22 = vpop.permute.xlu0 %235  ;;  %v238_v23 = vpop.permute.xlu1 %237 }
 0x28b   :  { %v239_v24 = vsel %vm636_vm9, %v236_v22, %v238_v23 }
 0x28c   :  { %v260_v27 = vmul.f32 %v253_v20, %v239_v24  ;;  %v269_v37 = vmul.f32 %v256_v30, %v239_v24 }
 0x28e   :  { %v241_v28 = vpop.permute.xlu0 %240  ;;  %v243_v29 = vpop.permute.xlu1 %242  ;;  %v261_v32 = vadd.f32 %v260_v27, %v259_v12 }
 0x28f   :  { %v244_v31 = vsel %vm636_vm9, %v241_v28, %v243_v29 }
 0x290   :  { %v262_v33 = vmul.f32 %v256_v30, %v244_v31  ;;  %v267_v34 = vmul.f32 %v253_v20, %v244_v31 }
 0x292   :  { %v268_v35 = vadd.f32 %v267_v34, %v266_v14  ;;  %v263_v36 = vsub.f32 %v261_v32, %v262_v33 }
 0x294   :  { %274 = vrot.lane.b32.xlu1 %v263_v36, %s462_s7  ;;  %272 = vrot.lane.b32.xlu0 %v263_v36, %s461_s29  ;;  %v270_v39 = vadd.f32 %v269_v37, %v268_v35 }
 0x298   :  { %279 = vrot.lane.b32.xlu1 %v270_v39, %s462_s7  ;;  %277 = vrot.lane.b32.xlu0 %v270_v39, %s461_s29 }
 0x29c   :  { %297 = vrot.lane.b32.xlu0 %v517_v4, %s463_s12 }
 0x306   :  { %v275_v42 = vpop.permute.xlu1 %274  ;;  %v273_v43 = vpop.permute.xlu0 %272 }
 0x307   :  { %v276_v47 = vsel %vm636_vm9, %v273_v43, %v275_v42 }
 0x308   :  { %v282_v11 = vsel %vm656_vm10, %v276_v47, %v263_v36 }
 0x309   :  { %302 = vrot.lane.b32.xlu0 %v282_v11, %s464_s16  ;;  %300 = vrot.lane.b32.xlu1 %v282_v11, %s463_s12  ;;  %v322_v55 = vmul.f32 %v312_v50, %v282_v11  ;;  %v330_v57 = vmul.f32 %v315_v51, %v282_v11 }
 0x30a   :  { %v280_v52 = vpop.permute.xlu1 %279  ;;  %v278_v53 = vpop.permute.xlu0 %277 }
 0x30b   :  { %v281_v54 = vsel %vm636_vm9, %v278_v53, %v280_v52 }
 0x30c   :  { %v283_v56 = vsel %vm656_vm10, %v281_v54, %v270_v39 }
 0x30d   :  { %307 = vrot.lane.b32.xlu0 %v283_v56, %s464_s16  ;;  %v323_v59 = vmul.f32 %v315_v51, %v283_v56  ;;  %v329_v60 = vmul.f32 %v312_v50, %v283_v56  ;;  %305 = vrot.lane.b32.xlu1 %v283_v56, %s463_s12 }
 0x30e   :  { %v298_v0 = vpop.permute.xlu0 %297 }
 0x30f   :  { %v324_v61 = vsub.f32 %v322_v55, %v323_v59  ;;  %v331_v62 = vadd.f32 %v330_v57, %v329_v60  ;;  %vm686_vm12 = vcmp.eq.s32.totalorder %v298_v0, %v296_v3 }
 0x37b   :  { %v301_v7 = vpop.permute.xlu1 %300  ;;  %v303_v8 = vpop.permute.xlu0 %302 }
 0x37c   :  { %v304_v4 = vsel %vm686_vm12, %v301_v7, %v303_v8 }
 0x37d   :  { %v325_v12 = vmul.f32 %v318_v5, %v304_v4  ;;  %v334_v22 = vmul.f32 %v321_v16, %v304_v4 }
 0x37f   :  { %v306_v14 = vpop.permute.xlu1 %305  ;;  %v308_v15 = vpop.permute.xlu0 %307  ;;  %v326_v18 = vadd.f32 %v325_v12, %v324_v61 }
 0x380   :  { %v309_v17 = vsel %vm686_vm12, %v306_v14, %v308_v15 }
 0x381   :  { %v327_v19 = vmul.f32 %v321_v16, %v309_v17  ;;  %v332_v13 = vmul.f32 %v318_v5, %v309_v17 }
 0x383   :  { %v333_v20 = vadd.f32 %v332_v13, %v331_v62  ;;  %v328_v21 = vsub.f32 %v326_v18, %v327_v19 }
 0x385   :  { %339 = vrot.lane.b32.xlu0 %v328_v21, %s464_s16  ;;  %337 = vrot.lane.b32.xlu1 %v328_v21, %s463_s12  ;;  %v335_v23 = vadd.f32 %v334_v22, %v333_v20 }
 0x389   :  { %344 = vrot.lane.b32.xlu0 %v335_v23, %s464_s16  ;;  %342 = vrot.lane.b32.xlu1 %v335_v23, %s463_s12 }
 0x3f7   :  { %v340_v24 = vpop.permute.xlu0 %339  ;;  %v338_v25 = vpop.permute.xlu1 %337 }
 0x3f8   :  { %v341_v26 = vsel %vm686_vm12, %v338_v25, %v340_v24 }
 0x3f9   :  { %v347_v27 = vsel %vm336_vm13, %v341_v26, %v328_v21 }
 0x3fa   :  { %349 = vst [vmem:[%s717_s4] sm:$0xff] %v347_v27 }
 0x3fb   :  { %v345_v28 = vpop.permute.xlu0 %344  ;;  %v343_v29 = vpop.permute.xlu1 %342 }
 0x3fc   :  { %v346_v30 = vsel %vm686_vm12, %v343_v29, %v345_v28 }
 0x3fd   :  { %v348_v31 = vsel %vm336_vm13, %v346_v30, %v335_v23 }
 0x3fe   :  { %402 = vst [vmem:[%s717_s4 + $0x8] sm:$0xff] %v348_v31 }
 0x3ff   :  { %356 = vsyncpa [#allocation3], 1 }
 0x400   :  { %357 = vsyncpa [#allocation5], 1 }

</bundles_post_ra>
